<compile_context>
chip_gen: v7x
topology: tpu7x:2x2x1
jax: 0.10.0
libtpu: 0.0.40
codegen_flags: <defaults>
</compile_context>

<pallas_src>
import functools
import math

import jax
import jax.numpy as jnp
from jax.experimental import pallas as pl
from jax.experimental.pallas import tpu as pltpu


def _round_up(x, m):
    return (x + m - 1) // m * m


def _kl_sparse_kernel(x_ref, o_ref, acc_ref, *, sparsity_target, d_true,
                      tile_d, d_pad):
    # Grid: (feature_tiles, batch_tiles); batch (reduction) axis innermost.
    di = pl.program_id(0)
    ni = pl.program_id(1)

    # ---- one-time init of the persistent column-sum accumulator ------------
    @pl.when(jnp.logical_and(di == 0, ni == 0))
    def _():
        acc_ref[...] = jnp.zeros_like(acc_ref)

    # ---- streaming phase: accumulate column sums over the batch ------------
    # Native-dtype DMA; cast to f32 right after the load (keeps all math f32,
    # which also matters on v5e where bf16 VPU math is not native).
    x = x_ref[...].astype(jnp.float32)            # (tn, td)
    tn = x.shape[0]

    if tn >= 128:
        # Batch reduction on the MXU: ones @ x replicates the per-column sum
        # across 8 sublanes, keeping the VPU/XLU free.
        ones = jnp.ones((8, tn), jnp.float32)
        partial = jnp.dot(ones, x, preferred_element_type=jnp.float32)  # (8, td)
    else:
        # Small batch tile: plain sublane reduction (broadcasts over the 8
        # accumulator sublanes below, keeping all rows identical).
        partial = jnp.sum(x, axis=0, keepdims=True)                     # (1, td)

    if tile_d == d_pad:
        # Single feature tile: static full-slice accumulate.
        acc_ref[...] += partial
    else:
        # Lane-aligned dynamic slice (tile_d is a multiple of 128).
        d_off = pl.multiple_of(di * tile_d, tile_d)
        acc_ref[:, pl.ds(d_off, tile_d)] += partial

    # ---- finalize on the last grid step -------------------------------------
    @pl.when(jnp.logical_and(di == pl.num_programs(0) - 1,
                             ni == pl.num_programs(1) - 1))
    def _():
        # Every sublane of acc mirrors the accumulated column sums; row 0 is
        # the full (1, d_pad) column-sum vector.
        col = acc_ref[0:1, :]                       # (1, d_pad), f32

        # q = mean_over_batch / sum(mean_over_batch) == col / sum(col)
        # (the 1/N factors cancel).  One scalar reciprocal instead of a
        # broadcast divide.  NOTE: all-zero input gives NaN here, matching the
        # PyTorch module's behavior (0/0).
        inv_s = 1.0 / jnp.sum(col)
        q = jnp.clip(col * inv_s, 1e-8, 1.0 - 1e-8)

        p = float(sparsity_target)
        log_p = math.log(p)
        log_1mp = math.log(1.0 - p)
        # s1 + s2 fused into ONE reduction; log(p), log(1-p) hoisted as Python
        # constants; no per-element divides (only the two unavoidable logs,
        # which go to the EUP).
        term = (p * (log_p - jnp.log(q))
                + (1.0 - p) * (log_1mp - jnp.log(1.0 - q)))
        if d_true != d_pad:
            # Mask zero-padded feature columns (they clamp to 1e-8 and would
            # otherwise contribute spurious KL mass).
            lane = jax.lax.broadcasted_iota(jnp.int32, term.shape, 1)
            term = jnp.where(lane < d_true, term, 0.0)

        o_ref[0, 0] = jnp.sum(term)


def kl_sparse_loss(x_nchw, sparsity_target=0.05):
    """Pallas implementation of KLSparseLoss.forward.

    Args:
      x_nchw: (N, C, H, W) array (any float dtype; DMA'd in native dtype,
        computed in f32 in-kernel).
      sparsity_target: scalar target sparsity p.

    Returns:
      scalar f32 KL sparsity loss.
    """
    n = x_nchw.shape[0]
    d = 1
    for s in x_nchw.shape[1:]:
        d *= s
    x2d = x_nchw.reshape(n, d)          # keep native dtype; cast inside kernel
    itemsize = jnp.dtype(x2d.dtype).itemsize

    # ---- tile sizing ---------------------------------------------------------
    # Feature (lane) tile: up to 4096 lanes, multiple of 128.
    TD_CAP = 4096
    d_pad = _round_up(d, 128)           # lane-dense feature axis
    if d_pad <= TD_CAP:
        td = d_pad
    else:
        td = TD_CAP
        d_pad = _round_up(d_pad, td)

    # Batch (sublane) tile: target ~4 MiB per DMA buffer (dtype-aware), so the
    # double-buffered input stream sits near the HBM roofline on all chips.
    buf_budget = 4 * 1024 * 1024
    tn_cap = max(128, min(1024, (buf_budget // (td * itemsize)) // 128 * 128))
    if n <= tn_cap:
        tn = n                          # full (small) batch as one tile
        n_pad = n
    else:
        tn = tn_cap
        n_pad = _round_up(n, tn)

    if (n_pad, d_pad) != (n, d):
        # Zero padding: padded rows/columns contribute 0 to the column sums;
        # padded columns are masked out in the finalize.
        x2d = jnp.pad(x2d, ((0, n_pad - n), (0, d_pad - d)))

    grid = (d_pad // td, n_pad // tn)

    # VMEM budget: double-buffered input tile + persistent column-sum scratch,
    # clamped to [32 MiB, 64 MiB] (v7x physical VMEM is 64 MiB per TC).
    vmem_need = 2 * tn * td * itemsize + 8 * d_pad * 4 + (2 << 20)
    vmem_limit = int(min(max(32 << 20, vmem_need), 64 << 20))

    cost = pl.CostEstimate(
        flops=int(n_pad * d_pad + 10 * d_pad),
        transcendentals=int(2 * d_pad),
        bytes_accessed=int(n_pad * d_pad * itemsize + 4),
    )

    kernel = functools.partial(
        _kl_sparse_kernel,
        sparsity_target=float(sparsity_target),
        d_true=d,
        tile_d=td,
        d_pad=d_pad,
    )

    out = pl.pallas_call(
        kernel,
        out_shape=jax.ShapeDtypeStruct((1, 1), jnp.float32),
        grid=grid,
        in_specs=[pl.BlockSpec((tn, td), lambda di, ni: (ni, di))],
        out_specs=pl.BlockSpec(memory_space=pltpu.SMEM),   # scalar -> SMEM
        scratch_shapes=[pltpu.VMEM((8, d_pad), jnp.float32)],
        compiler_params=pltpu.CompilerParams(
            # Output/accumulator persist across both axes -> both "arbitrary".
            dimension_semantics=("arbitrary", "arbitrary"),
            vmem_limit_bytes=vmem_limit,
        ),
        cost_estimate=cost,
    )(x2d)
    return out[0, 0]


def _reference(x_nchw, sparsity_target=0.05):
    # Pure-JAX reference mirroring the PyTorch module.
    x = jnp.mean(x_nchw.astype(jnp.float32), axis=0, keepdims=True)
    q = x / jnp.sum(x)
    q = jnp.clip(q, 1e-8, 1.0 - 1e-8)
    p = jnp.float32(sparsity_target)
    s1 = jnp.sum(p * jnp.log(p / q))
    s2 = jnp.sum((1.0 - p) * jnp.log((1.0 - p) / (1.0 - q)))
    return s1 + s2


if __name__ == "__main__":
    key = jax.random.PRNGKey(0)
    # Small NCHW activations; positive (sparsity losses operate on
    # non-negative activations, e.g. post-sigmoid).
    x = jax.random.uniform(key, (2, 4, 16, 16), dtype=jnp.float32,
                           minval=0.0, maxval=1.0)

    loss = jax.block_until_ready(kl_sparse_loss(x, sparsity_target=0.05))
    ref = jax.block_until_ready(_reference(x, sparsity_target=0.05))
    assert jnp.allclose(loss, ref, rtol=1e-5, atol=1e-5), (loss, ref)

    print("KERNEL_OK")
</pallas_src>

<mosaic_0001>
module attributes {stable_mosaic.version = 11 : i64} {
  func.func @_kl_sparse_kernel(%arg0: i32, %arg1: i32, %arg2: memref<2x1024xf32, #tpu.memory_space<vmem>>, %arg3: memref<1x1xf32, #tpu.memory_space<smem>>, %arg4: memref<8x1024xf32, #tpu.memory_space<vmem>>) attributes {dimension_semantics = [#tpu.dimension_semantics<arbitrary>, #tpu.dimension_semantics<arbitrary>], iteration_bounds = array<i64: 1, 1>, scalar_prefetch = 0 : i64, scratch_operands = 1 : i64, tpu.core_type = #tpu.core_type<tc>, window_params = [{transform_indices = @transform_0, window_bounds = array<i64: 2, 1024>}, {transform_indices = @transform_1, window_bounds = array<i64: 1, 1>}]} {
    %c0_i32 = arith.constant 0 : i32
    %0 = arith.cmpi eq, %arg0, %c0_i32 : i32
    %c0_i32_0 = arith.constant 0 : i32
    %1 = arith.cmpi eq, %arg1, %c0_i32_0 : i32
    %2 = arith.andi %0, %1 : i1
    %3 = arith.extui %2 : i1 to i32
    %c0_i32_1 = arith.constant 0 : i32
    %4 = arith.cmpi ne, %3, %c0_i32_1 : i32
    scf.if %4 {
      %cst_10 = arith.constant 0.000000e+00 : f32
      %17 = vector.broadcast %cst_10 : f32 to vector<8x1024xf32>
      %c0_11 = arith.constant 0 : index
      %c0_12 = arith.constant 0 : index
      %18 = vector.load %arg4[%c0_11, %c0_12] : memref<8x1024xf32, #tpu.memory_space<vmem>>, vector<8x1024xf32>
      tpu.vector_store %arg4[%c0_11, %c0_12], %17 {strides = array<i32>} : memref<8x1024xf32, #tpu.memory_space<vmem>>, vector<8x1024xf32>,
    } else {
    }
    %c0 = arith.constant 0 : index
    %c0_2 = arith.constant 0 : index
    %5 = vector.load %arg2[%c0, %c0_2] : memref<2x1024xf32, #tpu.memory_space<vmem>>, vector<2x1024xf32>
    %cst = arith.constant dense<0.000000e+00> : vector<1024xf32>
    %6 = vector.multi_reduction <add>, %5, %cst [0] : vector<2x1024xf32> to vector<1024xf32>
    %7 = vector.shape_cast %6 : vector<1024xf32> to vector<1x1024xf32>
    %c0_3 = arith.constant 0 : index
    %c0_4 = arith.constant 0 : index
    %8 = vector.load %arg4[%c0_3, %c0_4] : memref<8x1024xf32, #tpu.memory_space<vmem>>, vector<8x1024xf32>
    %9 = vector.broadcast %7 : vector<1x1024xf32> to vector<8x1024xf32>
    %10 = arith.addf %8, %9 : vector<8x1024xf32>
    %c0_5 = arith.constant 0 : index
    %c0_6 = arith.constant 0 : index
    %11 = vector.load %arg4[%c0_5, %c0_6] : memref<8x1024xf32, #tpu.memory_space<vmem>>, vector<8x1024xf32>
    tpu.vector_store %arg4[%c0_5, %c0_6], %10 {strides = array<i32>} : memref<8x1024xf32, #tpu.memory_space<vmem>>, vector<8x1024xf32>,
    %c0_i32_7 = arith.constant 0 : i32
    %12 = arith.cmpi eq, %arg0, %c0_i32_7 : i32
    %c0_i32_8 = arith.constant 0 : i32
    %13 = arith.cmpi eq, %arg1, %c0_i32_8 : i32
    %14 = arith.andi %12, %13 : i1
    %15 = arith.extui %14 : i1 to i32
    %c0_i32_9 = arith.constant 0 : i32
    %16 = arith.cmpi ne, %15, %c0_i32_9 : i32
    scf.if %16 {
      %c0_10 = arith.constant 0 : index
      %c0_11 = arith.constant 0 : index
      %17 = vector.load %arg4[%c0_10, %c0_11] : memref<8x1024xf32, #tpu.memory_space<vmem>>, vector<1x1024xf32>
      %18 = vector.shape_cast %17 : vector<1x1024xf32> to vector<1x1x1024xf32>
      %cst_12 = arith.constant dense<0.000000e+00> : vector<1xf32>
      %19 = vector.multi_reduction <add>, %18, %cst_12 [1, 2] : vector<1x1x1024xf32> to vector<1xf32>
      %20 = vector.shape_cast %19 : vector<1xf32> to vector<1x1x1xf32>
      %21 = vector.extract %20[0, 0, 0] : f32 from vector<1x1x1xf32>
      %cst_13 = arith.constant 1.000000e+00 : f32
      %22 = arith.divf %cst_13, %21 : f32
      %23 = vector.broadcast %22 : f32 to vector<1x1024xf32>
      %24 = arith.mulf %17, %23 : vector<1x1024xf32>
      %cst_14 = arith.constant 9.99999993E-9 : f32
      %cst_15 = arith.constant 1.000000e+00 : f32
      %25 = vector.broadcast %cst_14 : f32 to vector<1x1024xf32>
      %26 = arith.maximumf %25, %24 : vector<1x1024xf32>
      %27 = vector.broadcast %cst_15 : f32 to vector<1x1024xf32>
      %28 = arith.minimumf %27, %26 : vector<1x1024xf32>
      %29 = math.log %28 : vector<1x1024xf32>
      %cst_16 = arith.constant -2.99573231 : f32
      %30 = vector.broadcast %cst_16 : f32 to vector<1x1024xf32>
      %31 = arith.subf %30, %29 : vector<1x1024xf32>
      %cst_17 = arith.constant 5.000000e-02 : f32
      %32 = vector.broadcast %cst_17 : f32 to vector<1x1024xf32>
      %33 = arith.mulf %32, %31 : vector<1x1024xf32>
      %cst_18 = arith.constant 1.000000e+00 : f32
      %34 = vector.broadcast %cst_18 : f32 to vector<1x1024xf32>
      %35 = arith.subf %34, %28 : vector<1x1024xf32>
      %36 = math.log %35 : vector<1x1024xf32>
      %cst_19 = arith.constant -0.0512932949 : f32
      %37 = vector.broadcast %cst_19 : f32 to vector<1x1024xf32>
      %38 = arith.subf %37, %36 : vector<1x1024xf32>
      %cst_20 = arith.constant 0.949999988 : f32
      %39 = vector.broadcast %cst_20 : f32 to vector<1x1024xf32>
      %40 = arith.mulf %39, %38 : vector<1x1024xf32>
      %41 = arith.addf %33, %40 : vector<1x1024xf32>
      %42 = vector.shape_cast %41 : vector<1x1024xf32> to vector<1x1x1024xf32>
      %cst_21 = arith.constant dense<0.000000e+00> : vector<1xf32>
      %43 = vector.multi_reduction <add>, %42, %cst_21 [1, 2] : vector<1x1x1024xf32> to vector<1xf32>
      %44 = vector.shape_cast %43 : vector<1xf32> to vector<1x1x1xf32>
      %45 = vector.extract %44[0, 0, 0] : f32 from vector<1x1x1xf32>
      %c0_22 = arith.constant 0 : index
      %c0_23 = arith.constant 0 : index
      %46 = memref.load %arg3[%c0_22, %c0_23] : memref<1x1xf32, #tpu.memory_space<smem>>
      memref.store %45, %arg3[%c0_22, %c0_23] : memref<1x1xf32, #tpu.memory_space<smem>>
    } else {
    }
    return
  }
  func.func @transform_0(%arg0: i32, %arg1: i32) -> (i32, i32) {
    %c0_i32 = arith.constant 0 : i32
    return %arg1, %arg0 : i32, i32
  }
  func.func @transform_1(%arg0: i32, %arg1: i32) -> (i32, i32) {
    %c0_i32 = arith.constant 0 : i32
    %c0_i32_0 = arith.constant 0 : i32
    %c0_i32_1 = arith.constant 0 : i32
    return %c0_i32, %c0_i32_0 : i32, i32
  }
}

</mosaic_0001>

<bundles_post_ra>
// kernel: tpu_custom_call.1
= control target key start
LH: loop header
LB: loop body
LE: loop exit
PB: predicated region body
PF: predicated region fallthrough
CT: control target
= control target key end

     0   :  { %6 = vsyncpa [#allocation4], 0  ;;  %s485_s0 = inlined_call_operand.hbm [shape: f32[2,1024], index: 0, kind: input, shape index: {}]   ;;  %s486_s1 = inlined_call_operand.hbm [shape: f32[1,1], index: 1, kind: output, shape index: {}]  }
   0x1   :  { %7 = vsyncpa [#allocation5], 0  ;;  %s385_s6 = smov [#allocation3]   ;;  %s349_s10 = scalar_lea.hbm %s485_s0, 256 }
   0x2   :  { %s14_s7 = sshll.u32 %s385_s6, 4  ;;  %p350_p0 = scmp.ne.s32.totalorder %s485_s0, %s349_s10  ;;  %s15_s7 = int_to_ptr.vmem [resolvable:$true] %s14_s7 }
   0x3   :  { %p353_p1 = scmp.lt.u32.totalorder %s349_s10, %s485_s0 }
   0x5   :  { %p355_p2 = pnand %p353_p1, %p350_p0 }
   0x7   :  { %358 = shalt.err (!%p355_p2)
}
   0x8   :  { %s359_s15 = scalar_lea.vmem %s15_s7, 256  ;;  %p364_p4 = scmp.lt.s32.totalorder %s15_s7, %s15_s7 }
   0x9   :  { %p360_p3 = scmp.ne.s32.totalorder %s15_s7, %s359_s15  ;;  %p365_p5 = scmp.lt.s32.totalorder %s359_s15, %s359_s15 }
   0xb   :  { %p366_p6 = por %p365_p5, %p364_p4 }
   0xd   :  { %p367_p7 = pnand %p366_p6, %p360_p3 }
   0xf   :  { %370 = shalt.err (!%p367_p7)
}
  0x10   :  { %17 = dma.hbm_to_vmem [thread:$0]  %s485_s0, 256, %s15_s7, [#allocation4]  }
  0x11   :  { %381 = dma.done.wait [#allocation4], 256  }
  0x12   :  { %382 = vsyncadd [#allocation4], 4294967040  ;;  %v43_v0 = vlaneseq  ;;  %v386_v1 = vmov 1983009808   ;;  %v35_v6 = vld [vmem:[#allocation3] sm:$0xff]  ;;  %v36_v7 = vld [vmem:[#allocation3 + $0x8] sm:$0xff] }
  0x13   :  { %v41_v2 = vunpack.c.l.s4 %v386_v1  ;;  %vm81_vm0 = vcmask 1041408   ;;  %v39_v8 = vcombine.high %v35_v6, %v35_v6  ;;  %v56_v10 = vcombine.high %v36_v7, %v36_v7  ;;  %s371_s22 = scalar_lea.hbm %s486_s1, 16 }
  0x14   :  { %v410_v3 = vshrl.u32 %v43_v0, 7  ;;  %vm208_vm1 = vcmask 1040384   ;;  %p372_p8 = scmp.ne.s32.totalorder %s486_s1, %s371_s22  ;;  %p375_p9 = scmp.lt.u32.totalorder %s371_s22, %s486_s1 }
  0x15   :  { %v42_v4 = vunpack.c.0.s8 %v41_v2 }
  0x16   :  { %p377_p10 = pnand %p375_p9, %p372_p8 }
  0x17   :  { %v45_v5 = vsub.s32 %v42_v4, %v410_v3 }
  0x19   :  { %v46_v9 = vrot.slane %v35_v6, %v45_v5  ;;  %v63_v11 = vrot.slane %v36_v7, %v45_v5  ;;  %v53_v12 = vrot.slane %v39_v8, %v45_v5  ;;  %v70_v14 = vrot.slane %v56_v10, %v45_v5 }
  0x1b   :  { %v54_v13 = vcombine.high %v46_v9, %v46_v9  ;;  %v71_v15 = vcombine.high %v63_v11, %v63_v11  ;;  %v82_v16 = vsel %vm81_vm0, %v46_v9, 0.0  ;;  %v110_v17 = vsel %vm81_vm0, %v63_v11, 0.0 }
  0x1c   :  { %v55_v18 = vcombine.high %v53_v12, %v53_v12  ;;  %v72_v19 = vcombine.high %v70_v14, %v70_v14  ;;  %v83_v20 = vrot.slane %v82_v16, 4  ;;  %v96_v23 = vsel %vm81_vm0, %v53_v12, 0.0 }
  0x1d   :  { %v89_v21 = vsel %vm81_vm0, %v54_v13, 0.0  ;;  %v111_v24 = vrot.slane %v110_v17, 4  ;;  %v117_v25 = vsel %vm81_vm0, %v71_v15, 0.0  ;;  %v97_v27 = vrot.slane %v96_v23, 4 }
  0x1e   :  { %v90_v22 = vrot.slane %v89_v21, 4  ;;  %v84_v26 = vadd.f32 %v83_v20, %v82_v16  ;;  %v103_v28 = vsel %vm81_vm0, %v55_v18, 0.0  ;;  %v118_v29 = vrot.slane %v117_v25, 4 }
  0x1f   :  { %v104_v31 = vrot.slane %v103_v28, 4  ;;  %v112_v32 = vadd.f32 %v111_v24, %v110_v17  ;;  %v124_v33 = vsel %vm81_vm0, %v70_v14, 0.0  ;;  %v98_v35 = vadd.f32 %v97_v27, %v96_v23 }
  0x20   :  { %v91_v30 = vadd.f32 %v90_v22, %v89_v21  ;;  %v85_v34 = vrot.slane %v84_v26, 2  ;;  %v119_v36 = vadd.f32 %v118_v29, %v117_v25  ;;  %v125_v37 = vrot.slane %v124_v33, 4 }
  0x21   :  { %v105_v39 = vadd.f32 %v104_v31, %v103_v28  ;;  %v113_v40 = vrot.slane %v112_v32, 2  ;;  %v131_v41 = vsel %vm81_vm0, %v72_v19, 0.0  ;;  %v99_v43 = vrot.slane %v98_v35, 2 }
  0x22   :  { %v92_v38 = vrot.slane %v91_v30, 2  ;;  %v86_v42 = vadd.f32 %v85_v34, %v84_v26  ;;  %v120_v44 = vrot.slane %v119_v36, 2  ;;  %v126_v45 = vadd.f32 %v125_v37, %v124_v33 }
  0x23   :  { %v106_v47 = vrot.slane %v105_v39, 2  ;;  %v114_v48 = vadd.f32 %v113_v40, %v112_v32  ;;  %v132_v49 = vrot.slane %v131_v41, 4  ;;  %v100_v51 = vadd.f32 %v99_v43, %v98_v35 }
  0x24   :  { %v93_v46 = vadd.f32 %v92_v38, %v91_v30  ;;  %v87_v50 = vrot.slane %v86_v42, 1  ;;  %v121_v52 = vadd.f32 %v120_v44, %v119_v36  ;;  %v127_v53 = vrot.slane %v126_v45, 2 }
  0x25   :  { %v107_v55 = vadd.f32 %v106_v47, %v105_v39  ;;  %v115_v56 = vrot.slane %v114_v48, 1  ;;  %v133_v57 = vadd.f32 %v132_v49, %v131_v41  ;;  %v101_v59 = vrot.slane %v100_v51, 1 }
  0x26   :  { %v94_v54 = vrot.slane %v93_v46, 1  ;;  %v88_v58 = vadd.f32 %v87_v50, %v86_v42  ;;  %v122_v60 = vrot.slane %v121_v52, 1  ;;  %v128_v61 = vadd.f32 %v127_v53, %v126_v45 }
  0x27   :  { %v108_v63 = vrot.slane %v107_v55, 1  ;;  %v116_v0 = vadd.f32 %v115_v56, %v114_v48  ;;  %v134_v1 = vrot.slane %v133_v57, 2  ;;  %v102_v2 = vadd.f32 %v101_v59, %v100_v51 }
  0x28   :  { %v95_v62 = vadd.f32 %v94_v54, %v93_v46  ;;  %v123_v4 = vadd.f32 %v122_v60, %v121_v52  ;;  %v129_v5 = vrot.slane %v128_v61, 1  ;;  %154 = vst [vmem:[#allocation2] sm:$0xff] %v88_v58  ;;  %v170_v12 = vsub.s32 0, %v410_v3 }
  0x29   :  { %v109_v6 = vadd.f32 %v108_v63, %v107_v55  ;;  %v135_v7 = vadd.f32 %v134_v1, %v133_v57  ;;  %158 = vst [vmem:[#allocation2 + $0x20] sm:$0xff] %v116_v0  ;;  %156 = vst [vmem:[#allocation2 + $0x10] sm:$0xff] %v102_v2  ;;  %v174_v13 = vsub.s32 1, %v410_v3  ;;  %v178_v14 = vsub.s32 2, %v410_v3 }
  0x2a   :  { %v130_v8 = vadd.f32 %v129_v5, %v128_v61  ;;  %155 = vst [vmem:[#allocation2 + $0x8] sm:$0xff] %v95_v62  ;;  %159 = vst [vmem:[#allocation2 + $0x28] sm:$0xff] %v123_v4  ;;  %v182_v15 = vsub.s32 3, %v410_v3  ;;  %v186_v18 = vsub.s32 4, %v410_v3  ;;  %v190_v19 = vsub.s32 5, %v410_v3 }
  0x2b   :  { %v136_v9 = vrot.slane %v135_v7, 1  ;;  %157 = vst [vmem:[#allocation2 + $0x18] sm:$0xff] %v109_v6  ;;  %v194_v24 = vsub.s32 6, %v410_v3  ;;  %v198_v31 = vsub.s32 7, %v410_v3 }
  0x2c   :  { %160 = vst [vmem:[#allocation2 + $0x30] sm:$0xff] %v130_v8 }
  0x2d   :  { %v137_v10 = vadd.f32 %v136_v9, %v135_v7 }
  0x2f   :  { %161 = vst [vmem:[#allocation2 + $0x38] sm:$0xff] %v137_v10 }
  0x32   :  { %v164_v11 = vld [vmem:[#allocation2] ss:$8 sm:$0xf] }
  0x36   :  { %v165_v16 = vld [vmem:[#allocation2] ss:$8 sm:$0xf0] }
  0x37   :  { %v166_v17 = vor.u32 %v165_v16, %v164_v11 }
  0x39   :  { %v171_v20 = vrot.slane %v166_v17, %v170_v12  ;;  %v175_v21 = vrot.slane %v166_v17, %v174_v13  ;;  %v179_v22 = vrot.slane %v166_v17, %v178_v14  ;;  %v183_v23 = vrot.slane %v166_v17, %v182_v15 }
  0x3a   :  { %v187_v25 = vrot.slane %v166_v17, %v186_v18  ;;  %v191_v30 = vrot.slane %v166_v17, %v190_v19  ;;  %v195_v34 = vrot.slane %v166_v17, %v194_v24  ;;  %v199_v37 = vrot.slane %v166_v17, %v198_v31 }
  0x3b   :  { %v209_v26 = vsel %vm208_vm1, %v171_v20, 0.0  ;;  %v210_v27 = vsel %vm208_vm1, %v175_v21, 0.0  ;;  %v212_v28 = vsel %vm208_vm1, %v179_v22, 0.0  ;;  %v214_v32 = vsel %vm208_vm1, %v183_v23, 0.0 }
  0x3c   :  { %v211_v29 = vadd.f32 %v210_v27, %v209_v26  ;;  %v216_v35 = vsel %vm208_vm1, %v187_v25, 0.0  ;;  %v218_v38 = vsel %vm208_vm1, %v191_v30, 0.0  ;;  %v220_v40 = vsel %vm208_vm1, %v195_v34, 0.0 }
  0x3d   :  { %v222_v42 = vsel %vm208_vm1, %v199_v37, 0.0 }
  0x3e   :  { %v213_v33 = vadd.f32 %v212_v28, %v211_v29 }
  0x40   :  { %v215_v36 = vadd.f32 %v214_v32, %v213_v33 }
  0x42   :  { %v217_v39 = vadd.f32 %v216_v35, %v215_v36 }
  0x44   :  { %v219_v41 = vadd.f32 %v218_v38, %v217_v39 }
  0x46   :  { %v221_v43 = vadd.f32 %v220_v40, %v219_v41 }
  0x48   :  { %v223_v44 = vadd.f32 %v222_v42, %v221_v43 }
  0x4a   :  { %224 = vadd.xlane.f32.xlu0 %v223_v44 }
  0xd7   :  { %v225_v45 = vpop.xlane.xlu0 %224 }
  0xd8   :  { %v226_v46 = vrot.slane %v225_v45, 4 }
  0xda   :  { %v227_v47 = vadd.f32 %v226_v46, %v225_v45 }
  0xdc   :  { %v228_v48 = vrot.slane %v227_v47, 2 }
  0xde   :  { %v229_v49 = vadd.f32 %v228_v48, %v227_v47 }
  0xe0   :  { %v230_v50 = vrot.slane %v229_v49, 1 }
  0xe2   :  { %v231_v51 = vadd.f32 %v230_v50, %v229_v49 }
  0xe4   :  { %331 = vpush %v231_v51 }
 0x115   :  { %s332_s0 = spop %331 }
 0x116   :  { %v233_v52 = vstv %s332_s0 }
 0x117   :  { %343 = vrcp.f32 %v233_v52 }
 0x121   :  { %v344_v53 = vpop.eup %343 }
 0x122   :  { %333 = vpush %v344_v53 }
 0x153   :  { %s334_s18 = spop %333 }
 0x154   :  { %v236_v54 = vstv %s334_s18 }
 0x155   :  { %v237_v55 = vmul.f32 %v236_v54, %v166_v17 }
 0x157   :  { %v238_v56 = vmax.f32 %v237_v55, 1e-08 }
 0x159   :  { %v239_v57 = vmin.f32 %v238_v56, 1.0 }
 0x15b   :  { %345 = vlog2.f32 %v239_v57  ;;  %v244_v58 = vsub.f32 1.0, %v239_v57 }
 0x15d   :  { %347 = vlog2.f32 %v244_v58 }
 0x165   :  { %v346_v59 = vpop.eup %345 }
 0x166   :  { %v241_v60 = vmul.f32 0.6931472, %v346_v59 }
 0x167   :  { %v348_v61 = vpop.eup %347 }
 0x168   :  { %v242_v62 = vsub.f32 -2.9957323, %v241_v60  ;;  %v246_v63 = vmul.f32 0.6931472, %v348_v61 }
 0x16a   :  { %v247_v0 = vsub.f32 -0.051293295, %v246_v63  ;;  %v243_v1 = vmul.f32 0.05, %v242_v62 }
 0x16c   :  { %v248_v2 = vmul.f32 0.95, %v247_v0 }
 0x16e   :  { %v249_v4 = vadd.f32 %v248_v2, %v243_v1 }
 0x170   :  { %v254_v5 = vrot.slane %v249_v4, %v170_v12  ;;  %v258_v6 = vrot.slane %v249_v4, %v174_v13  ;;  %v262_v7 = vrot.slane %v249_v4, %v178_v14  ;;  %v266_v8 = vrot.slane %v249_v4, %v182_v15 }
 0x171   :  { %v270_v16 = vrot.slane %v249_v4, %v186_v18  ;;  %v274_v13 = vrot.slane %v249_v4, %v190_v19  ;;  %v278_v15 = vrot.slane %v249_v4, %v194_v24  ;;  %v282_v23 = vrot.slane %v249_v4, %v198_v31 }
 0x172   :  { %v291_v9 = vsel %vm208_vm1, %v254_v5, 0.0  ;;  %v292_v10 = vsel %vm208_vm1, %v258_v6, 0.0  ;;  %v294_v17 = vsel %vm208_vm1, %v262_v7, 0.0  ;;  %v296_v20 = vsel %vm208_vm1, %v266_v8, 0.0 }
 0x173   :  { %v293_v11 = vadd.f32 %v292_v10, %v291_v9  ;;  %v298_v21 = vsel %vm208_vm1, %v270_v16, 0.0  ;;  %v300_v25 = vsel %vm208_vm1, %v274_v13, 0.0  ;;  %v302_v18 = vsel %vm208_vm1, %v278_v15, 0.0 }
 0x174   :  { %v304_v28 = vsel %vm208_vm1, %v282_v23, 0.0 }
 0x175   :  { %v295_v12 = vadd.f32 %v294_v17, %v293_v11 }
 0x177   :  { %v297_v14 = vadd.f32 %v296_v20, %v295_v12 }
 0x179   :  { %v299_v22 = vadd.f32 %v298_v21, %v297_v14 }
 0x17b   :  { %v301_v26 = vadd.f32 %v300_v25, %v299_v22 }
 0x17d   :  { %v303_v27 = vadd.f32 %v302_v18, %v301_v26 }
 0x17f   :  { %v305_v29 = vadd.f32 %v304_v28, %v303_v27 }
 0x181   :  { %306 = vadd.xlane.f32.xlu0 %v305_v29 }
 0x20e   :  { %v307_v19 = vpop.xlane.xlu0 %306 }
 0x20f   :  { %v308_v30 = vrot.slane %v307_v19, 4 }
 0x211   :  { %v309_v32 = vadd.f32 %v308_v30, %v307_v19 }
 0x213   :  { %v310_v33 = vrot.slane %v309_v32, 2 }
 0x215   :  { %v311_v3 = vadd.f32 %v310_v33, %v309_v32 }
 0x217   :  { %v312_v24 = vrot.slane %v311_v3, 1 }
 0x219   :  { %v313_v34 = vadd.f32 %v312_v24, %v311_v3 }
 0x21b   :  { %335 = vpush %v313_v34 }
 0x24c   :  { %s336_s19 = spop %335 }
 0x24d   :  { %316 = sst [smem:[#allocation6]] %s336_s19 }
 0x24e   :  { %380 = shalt.err (!%p377_p10)
}
 0x24f   :  { %s387_s27 = smov [#allocation6]  }
 0x250   :  { %324 = dma.smem_to_hbm %s387_s27, 16, %s486_s1, [#allocation5]  }
 0x251   :  { %383 = dma.done.wait [#allocation5], 16  }
 0x252   :  { %384 = vsyncadd [#allocation5], 4294967280 }
 0x253   :  { %328 = sfence }
 0x254   :  { %329 = vsyncpa [#allocation4], 1 }
 0x255   :  { %330 = vsyncpa [#allocation5], 1 }

</bundles_post_ra>
